<compile_context>
chip_gen: v5e
topology: v5e:2x2
jax: 0.10.0
libtpu: 0.0.40
codegen_flags: <defaults>
</compile_context>

<pallas_src>
import functools
import math

import jax
import jax.numpy as jnp
import numpy as np
from jax import lax
from jax.experimental import pallas as pl
from jax.experimental.pallas import tpu as pltpu


def _downsample_kernel(x_ref, s_ref, o_ref, *, ho, chunk):
    # x_ref: (tnc, H*W)    one image per sublane row, pixels flattened on lanes
    # s_ref: (W, Wo)       constant 0/1 matrix selecting even W positions
    # o_ref: (tnc, Ho*Wo)  downsampled images, flattened on lanes
    tnc = x_ref.shape[0]
    w = s_ref.shape[0]
    sel = s_ref[...]  # (W, Wo) f32 — loaded once per grid step (hoisted)

    def body(k, carry):
        r0 = pl.multiple_of(k * chunk, chunk)
        v = x_ref[pl.ds(r0, chunk), :]                       # (chunk, H*W), 1 load
        pieces = []
        for i in range(ho):   # static unroll; each piece is ~1-2 vregs live
            # Input row 2*i occupies lanes [2*i*w, 2*i*w + w): static slice.
            row = v[:, 2 * i * w:2 * i * w + w].astype(jnp.float32)
            pieces.append(
                jnp.dot(row, sel,
                        preferred_element_type=jnp.float32,
                        precision=lax.Precision.HIGHEST))    # (chunk, Wo) on MXU
        y = jnp.concatenate(pieces, axis=1)                  # (chunk, Ho*Wo)
        o_ref[pl.ds(r0, chunk), :] = y.astype(o_ref.dtype)   # 1 lane-dense store
        return carry

    lax.fori_loop(0, tnc // chunk, body, 0)


def _round_up(n, m):
    return ((n + m - 1) // m) * m


def _pick_block_rows(nc, max_rows, chunk):
    """Largest multiple-of-`chunk` divisor of nc that fits max_rows; prefer a
    choice that leaves >= 2 grid steps (v7x megacore sharding)."""
    cands = [d for d in range(chunk, nc + 1, chunk)
             if nc % d == 0 and d <= max_rows]
    if not cands:
        return 0
    multi = [d for d in cands if nc // d >= 2]
    return max(multi) if multi else max(cands)


def downsample_stride(x):
    """Pallas TPU equivalent of PyTorch DownsampleStride: x[..., ::2, ::2]."""
    *lead, h, w = x.shape
    ho, wo = (h + 1) // 2, (w + 1) // 2
    nc = math.prod(lead) if lead else 1
    dtype = x.dtype
    itemsize = jnp.dtype(dtype).itemsize

    chunk = 8 if itemsize == 4 else 16          # sublane-tile aligned chunks
    dtype_ok = (dtype == jnp.float32) or (dtype == jnp.bfloat16)
    pallas_ok = dtype_ok and nc % chunk == 0 and h >= 1 and w >= 1

    # Padded per-row VMEM bytes (lane dim rounds up to 128); budget covers the
    # double-buffered input + output blocks (the small constant S block adds
    # ~2*round_up(w,8)*128*4 B on top, negligible).  16 MiB total fits v6e's
    # 32 MiB scoped default, v7x's 32 MiB default / 64 MiB physical, and v5e
    # once the scoped limit is raised via vmem_limit_bytes below.
    row_bytes = (_round_up(h * w, 128) + _round_up(ho * wo, 128)) * itemsize
    budget = 16 * 1024 * 1024
    max_rows = budget // max(1, 2 * row_bytes)

    tnc = _pick_block_rows(nc, max_rows, chunk) if pallas_ok else 0
    if tnc == 0:
        # TODO(synk): integer / fp8 dtypes, nc not a multiple of 8(f32)/16(bf16)
        # and pathologically huge H*W fall back to a plain XLA strided slice.
        return x[..., ::2, ::2]

    x2 = x.reshape(nc, h * w)  # free, order-preserving view
    # Constant 0/1 column-selection matrix: sel[a, b] = (a == 2*b).
    sel = (jnp.arange(w)[:, None] == 2 * jnp.arange(wo)[None, :]).astype(jnp.float32)

    kernel = functools.partial(_downsample_kernel, ho=ho, chunk=chunk)

    in_bytes = nc * h * w * itemsize
    out_bytes = nc * ho * wo * itemsize

    out = pl.pallas_call(
        kernel,
        out_shape=jax.ShapeDtypeStruct((nc, ho * wo), dtype),
        grid=(nc // tnc,),
        in_specs=[
            pl.BlockSpec((tnc, h * w), lambda i: (i, 0)),
            # Constant block index -> fetched once, re-fetch elided across steps.
            pl.BlockSpec((w, wo), lambda i: (0, 0)),
        ],
        out_specs=pl.BlockSpec((tnc, ho * wo), lambda i: (i, 0)),
        compiler_params=pltpu.CompilerParams(
            dimension_semantics=("parallel",),
            vmem_limit_bytes=32 * 1024 * 1024,
        ),
        cost_estimate=pl.CostEstimate(
            flops=2 * nc * ho * w * wo,
            transcendentals=0,
            bytes_accessed=in_bytes + out_bytes + w * wo * 4),
    )(x2, sel)

    return out.reshape(*lead, ho, wo)


if __name__ == "__main__":
    key = jax.random.PRNGKey(0)
    fn = jax.jit(downsample_stride)

    cases = [
        (2, 4, 16, 16),   # primary small test shape
        (2, 8, 32, 32),   # CIFAR-ResNet-like stage; exercises a multi-step grid
        (2, 4, 15, 15),   # odd spatial dims
    ]
    for idx, shape in enumerate(cases):
        k = jax.random.fold_in(key, idx)
        x = jax.random.normal(k, shape, dtype=jnp.float32)
        y = jax.block_until_ready(fn(x))
        y_ref = x[..., ::2, ::2]   # same semantics as torch x[..., ::2, ::2]
        assert y.shape == y_ref.shape, (y.shape, y_ref.shape)
        assert y.dtype == y_ref.dtype, (y.dtype, y_ref.dtype)
        # Bit-exact in practice; tiny tolerance only guards MXU pass-splitting
        # corner cases on some generations.
        np.testing.assert_allclose(np.asarray(y), np.asarray(y_ref),
                                   rtol=1e-6, atol=1e-6)

    print("KERNEL_OK")
</pallas_src>

<mosaic_0001>
module attributes {stable_mosaic.version = 11 : i64} {
  func.func @_downsample_kernel(%arg0: i32, %arg1: memref<8x256xf32, #tpu.memory_space<vmem>>, %arg2: memref<16x8xf32, #tpu.memory_space<vmem>>, %arg3: memref<8x64xf32, #tpu.memory_space<vmem>>) attributes {dimension_semantics = [#tpu.dimension_semantics<parallel>], iteration_bounds = array<i64: 1>, scalar_prefetch = 0 : i64, scratch_operands = 0 : i64, tpu.core_type = #tpu.core_type<tc>, window_params = [{transform_indices = @transform_0, window_bounds = array<i64: 8, 256>}, {pipeline_mode = #tpu.pipeline_mode<synchronous>, transform_indices = @transform_1, window_bounds = array<i64: 16, 8>}, {transform_indices = @transform_2, window_bounds = array<i64: 8, 64>}]} {
    %c0 = arith.constant 0 : index
    %c0_0 = arith.constant 0 : index
    %0 = vector.load %arg2[%c0, %c0_0] : memref<16x8xf32, #tpu.memory_space<vmem>>, vector<16x8xf32>
    %c0_i32 = arith.constant 0 : i32
    %c8_i32 = arith.constant 8 : i32
    %1 = arith.muli %c0_i32, %c8_i32 : i32
    %2 = tpu.assume_multiple %1, 8 : i32
    %3 = arith.index_cast %2 : i32 to index
    %c0_1 = arith.constant 0 : index
    %4 = vector.load %arg1[%3, %c0_1] : memref<8x256xf32, #tpu.memory_space<vmem>>, vector<8x256xf32>
    %5 = vector.extract_strided_slice %4 {offsets = [0, 0], sizes = [8, 16], strides = [1, 1]} : vector<8x256xf32> to vector<8x16xf32>
    %cst = arith.constant dense<0.000000e+00> : vector<8x8xf32>
    %6 = tpu.matmul %5, %0, %cst {dimension_numbers = #tpu.dot_dimension_numbers<[1], [0], [0], [1], [0, 0, 1, 1], [], []>, precision = #tpu.contract_precision<fp32>} : vector<8x16xf32>, vector<16x8xf32>, vector<8x8xf32> -> vector<8x8xf32>
    %7 = vector.extract_strided_slice %4 {offsets = [0, 32], sizes = [8, 16], strides = [1, 1]} : vector<8x256xf32> to vector<8x16xf32>
    %cst_2 = arith.constant dense<0.000000e+00> : vector<8x8xf32>
    %8 = tpu.matmul %7, %0, %cst_2 {dimension_numbers = #tpu.dot_dimension_numbers<[1], [0], [0], [1], [0, 0, 1, 1], [], []>, precision = #tpu.contract_precision<fp32>} : vector<8x16xf32>, vector<16x8xf32>, vector<8x8xf32> -> vector<8x8xf32>
    %9 = vector.extract_strided_slice %4 {offsets = [0, 64], sizes = [8, 16], strides = [1, 1]} : vector<8x256xf32> to vector<8x16xf32>
    %cst_3 = arith.constant dense<0.000000e+00> : vector<8x8xf32>
    %10 = tpu.matmul %9, %0, %cst_3 {dimension_numbers = #tpu.dot_dimension_numbers<[1], [0], [0], [1], [0, 0, 1, 1], [], []>, precision = #tpu.contract_precision<fp32>} : vector<8x16xf32>, vector<16x8xf32>, vector<8x8xf32> -> vector<8x8xf32>
    %11 = vector.extract_strided_slice %4 {offsets = [0, 96], sizes = [8, 16], strides = [1, 1]} : vector<8x256xf32> to vector<8x16xf32>
    %cst_4 = arith.constant dense<0.000000e+00> : vector<8x8xf32>
    %12 = tpu.matmul %11, %0, %cst_4 {dimension_numbers = #tpu.dot_dimension_numbers<[1], [0], [0], [1], [0, 0, 1, 1], [], []>, precision = #tpu.contract_precision<fp32>} : vector<8x16xf32>, vector<16x8xf32>, vector<8x8xf32> -> vector<8x8xf32>
    %13 = vector.extract_strided_slice %4 {offsets = [0, 128], sizes = [8, 16], strides = [1, 1]} : vector<8x256xf32> to vector<8x16xf32>
    %cst_5 = arith.constant dense<0.000000e+00> : vector<8x8xf32>
    %14 = tpu.matmul %13, %0, %cst_5 {dimension_numbers = #tpu.dot_dimension_numbers<[1], [0], [0], [1], [0, 0, 1, 1], [], []>, precision = #tpu.contract_precision<fp32>} : vector<8x16xf32>, vector<16x8xf32>, vector<8x8xf32> -> vector<8x8xf32>
    %15 = vector.extract_strided_slice %4 {offsets = [0, 160], sizes = [8, 16], strides = [1, 1]} : vector<8x256xf32> to vector<8x16xf32>
    %cst_6 = arith.constant dense<0.000000e+00> : vector<8x8xf32>
    %16 = tpu.matmul %15, %0, %cst_6 {dimension_numbers = #tpu.dot_dimension_numbers<[1], [0], [0], [1], [0, 0, 1, 1], [], []>, precision = #tpu.contract_precision<fp32>} : vector<8x16xf32>, vector<16x8xf32>, vector<8x8xf32> -> vector<8x8xf32>
    %17 = vector.extract_strided_slice %4 {offsets = [0, 192], sizes = [8, 16], strides = [1, 1]} : vector<8x256xf32> to vector<8x16xf32>
    %cst_7 = arith.constant dense<0.000000e+00> : vector<8x8xf32>
    %18 = tpu.matmul %17, %0, %cst_7 {dimension_numbers = #tpu.dot_dimension_numbers<[1], [0], [0], [1], [0, 0, 1, 1], [], []>, precision = #tpu.contract_precision<fp32>} : vector<8x16xf32>, vector<16x8xf32>, vector<8x8xf32> -> vector<8x8xf32>
    %19 = vector.extract_strided_slice %4 {offsets = [0, 224], sizes = [8, 16], strides = [1, 1]} : vector<8x256xf32> to vector<8x16xf32>
    %cst_8 = arith.constant dense<0.000000e+00> : vector<8x8xf32>
    %20 = tpu.matmul %19, %0, %cst_8 {dimension_numbers = #tpu.dot_dimension_numbers<[1], [0], [0], [1], [0, 0, 1, 1], [], []>, precision = #tpu.contract_precision<fp32>} : vector<8x16xf32>, vector<16x8xf32>, vector<8x8xf32> -> vector<8x8xf32>
    %21 = tpu.concatenate %6, %8, %10, %12, %14, %16, %18, %20 in 1 : vector<8x8xf32>, vector<8x8xf32>, vector<8x8xf32>, vector<8x8xf32>, vector<8x8xf32>, vector<8x8xf32>, vector<8x8xf32>, vector<8x8xf32> -> vector<8x64xf32>
    %22 = arith.index_cast %2 : i32 to index
    %c0_9 = arith.constant 0 : index
    %23 = vector.load %arg3[%22, %c0_9] : memref<8x64xf32, #tpu.memory_space<vmem>>, vector<8x64xf32>
    tpu.vector_store %arg3[%22, %c0_9], %21 {strides = array<i32>} : memref<8x64xf32, #tpu.memory_space<vmem>>, vector<8x64xf32>,
    %c1_i32 = arith.constant 1 : i32
    return
  }
  func.func @transform_0(%arg0: i32) -> (i32, i32) {
    %c0_i32 = arith.constant 0 : i32
    %c0_i32_0 = arith.constant 0 : i32
    return %arg0, %c0_i32 : i32, i32
  }
  func.func @transform_1(%arg0: i32) -> (i32, i32) {
    %c0_i32 = arith.constant 0 : i32
    %c0_i32_0 = arith.constant 0 : i32
    %c0_i32_1 = arith.constant 0 : i32
    return %c0_i32, %c0_i32_0 : i32, i32
  }
  func.func @transform_2(%arg0: i32) -> (i32, i32) {
    %c0_i32 = arith.constant 0 : i32
    %c0_i32_0 = arith.constant 0 : i32
    return %arg0, %c0_i32 : i32, i32
  }
}

</mosaic_0001>

<bundles_post_ra>
// kernel: downsample_stride.1
= control target key start
LH: loop header
LB: loop body
LE: loop exit
PB: predicated region body
PF: predicated region fallthrough
CT: control target
= control target key end

     0   :  { %vm18_vm0 = vcmask 130048   ;;  %s1377_s13 = smov 96   ;;  %s1378_s14 = smov 32   ;;  %vm1349_vm1 = vcmask 64512   ;;  %vm1352_vm2 = vcmask 195584   ;;  %vm1354_vm3 = vcmask 261120   ;;  %s1559_s0 = inlined_call_operand.vmem [shape: f32[8,256], index: 0, kind: input, shape index: {}]   ;;  %s1560_s1 = inlined_call_operand.vmem [shape: f32[16,8], index: 1, kind: input, shape index: {}]   ;;  %s1561_s2 = inlined_call_operand.vmem [shape: f32[8,64], index: 2, kind: output, shape index: {}]  }
   0x1   :  { %v16_v0 = vld [vmem:[%s1559_s0] sm:$0xff]  ;;  %v12_v1 = vld [vmem:[%s1560_s1 + $0x8] sm:$0xff]  ;;  %s1379_s19 = smov 64   ;;  %s1382_s20 = smov 24   ;;  %vm1356_vm4 = vcmask 326656   ;;  %vm1358_vm5 = vcmask 392192  }
   0x2   :  { %181 = vrot.lane.b32.xlu0 %v16_v0, %s1377_s13  ;;  %507 = vrot.lane.b32.xlu1 %v16_v0, %s1378_s14  ;;  %v1412_v2 = vld [vmem:[%s1559_s0 + $0x8] sm:$0xff]  ;;  %v1414_v3 = vand.u32 4294901760, %v12_v1  ;;  %v11_v4 = vld [vmem:[%s1560_s1] sm:$0xff]  ;;  %v20_v5 = vsel %vm18_vm0, %v16_v0, 0  ;;  %s1380_s0 = smov 8   ;;  %s1381_s1 = smov 16  }
   0x3   :  { %995 = vrot.lane.b32.xlu2 %v1412_v2, %s1379_s19  ;;  %v1421_v6 = vand.u32 4294901760, %v11_v4  ;;  %v40_v7 = vand.u32 4294901760, %v20_v5  ;;  %v671_v37 = vsel %vm18_vm0, %v1412_v2, 0  ;;  %s1383_s21 = smov 40   ;;  %s1384_s22 = smov 48   ;;  %vm1360_vm6 = vcmask 457728  }
   0x4   :  { %37 = vmatpush.msra.mxu0 %v1414_v3  ;;  %v1425_v8 = vsub.f32 %v12_v1, %v1414_v3  ;;  %121 = vmatpush.msra.mxu3 %v1414_v3  ;;  %v691_v39 = vand.u32 4294901760, %v671_v37  ;;  %s1385_s23 = smov 56   ;;  %vm1362_vm7 = vcmask 523264  }
   0x5   :  { %v41_v9 = vsub.f32 %v20_v5, %v40_v7  ;;  %v1429_v10 = vsub.f32 %v11_v4, %v1421_v6 }
   0x6   :  { %39 = vmatpush.msra.mxu0 %v1421_v6  ;;  %v1433_v11 = vand.u32 4294901760, %v1425_v8  ;;  %123 = vmatpush.msra.mxu3 %v1421_v6  ;;  %v692_v41 = vsub.f32 %v671_v37, %v691_v39 }
   0x7   :  { %v42_v12 = vand.u32 4294901760, %v41_v9  ;;  %v1437_v13 = vand.u32 4294901760, %v1429_v10  ;;  %96 = vmatpush.msra.mxu2 %v1425_v8 }
   0x8   :  { %v66_v14 = vsub.f32 %v1425_v8, %v1433_v11  ;;  %148 = vmatpush.msrb.mxu0 %v1433_v11  ;;  %v693_v43 = vand.u32 4294901760, %v692_v41 }
   0x9   :  { %v43_v15 = vsub.f32 %v41_v9, %v42_v12  ;;  %v72_v16 = vsub.f32 %v1429_v10, %v1437_v13  ;;  %127 = vmatmul.f32.vlgmr.msra.gmra.mxu3 %v42_v12  ;;  %99 = vmatpush.msra.mxu2 %v1429_v10 }
   0xa   :  { %344 = vrot.lane.b32.xlu0 %v16_v0, %s1379_s19  ;;  %832 = vrot.lane.b32.xlu1 %v1412_v2, %s1377_s13  ;;  %v1448_v17 = vand.u32 4294901760, %v66_v14  ;;  %v694_v46 = vsub.f32 %v692_v41, %v693_v43 }
   0xb   :  { %1158 = vrot.lane.b32.xlu2 %v1412_v2, %s1378_s14  ;;  %v44_v18 = vand.u32 4294901760, %v43_v15  ;;  %v1452_v19 = vand.u32 4294901760, %v72_v16  ;;  %152 = vmatpush.msrb.mxu0 %v1437_v13 }
   0xc   :  { %68 = vmatpush.msra.mxu1 %v1448_v17  ;;  %231 = vmatpush.msrb.mxu3 %v1448_v17  ;;  %v695_v48 = vand.u32 4294901760, %v694_v46 }
   0xd   :  { %45 = vmatmul.f32.vlgmr.msra.gmra.mxu0 %v44_v18  ;;  %102 = vmatmul.f32.vlgmr.msra.gmra.mxu2 %v41_v9 }
   0xe   :  { %74 = vmatpush.msra.mxu1 %v1452_v19  ;;  %237 = vmatpush.msrb.mxu3 %v1452_v19 }
   0xf   :  { %76 = vmatmul.f32.vlgmr.msra.gmra.mxu1 %v40_v7  ;;  %259 = vmatpush.msra.mxu0 %v1425_v8 }
  0x10   :  { %173 = vmatpush.msrb.mxu1 %v1414_v3  ;;  %200 = vmatpush.msrb.mxu2 %v1414_v3 }
  0x11   :  { %262 = vmatpush.msra.mxu0 %v1429_v10  ;;  %336 = vmatpush.msra.mxu3 %v1414_v3 }
  0x12   :  { %175 = vmatpush.msrb.mxu1 %v1421_v6  ;;  %202 = vmatpush.msrb.mxu2 %v1421_v6 }
  0x13   :  { %338 = vmatpush.msra.mxu3 %v1421_v6 }
  0x14   :  { %284 = vmatpush.msra.mxu1 %v1414_v3  ;;  %311 = vmatpush.msra.mxu2 %v1433_v11 }
  0x15   :  { %154 = vmatmul.f32.vlgmr.msrb.gmra.mxu0 %v40_v7 }
  0x16   :  { %286 = vmatpush.msra.mxu1 %v1421_v6  ;;  %315 = vmatpush.msra.mxu2 %v1437_v13 }
  0x17   :  { %363 = vmatpush.msrb.mxu0 %v1414_v3  ;;  %177 = vmatmul.f32.vlgmr.msrb.gmra.mxu1 %v40_v7 }
  0x18   :  { %394 = vmatpush.msrb.mxu1 %v1448_v17 }
  0x19   :  { %365 = vmatpush.msrb.mxu0 %v1421_v6 }
  0x1a   :  { %400 = vmatpush.msrb.mxu1 %v1452_v19 }
  0x5d   :  { %v996_v50 = vpop.permute.xlu2 %995 }
  0x5e   :  { %v997_v51 = vsel %vm18_vm0, %v996_v50, 0 }
  0x5f   :  { %v1017_v53 = vand.u32 4294901760, %v997_v51 }
  0x61   :  { %v1018_v55 = vsub.f32 %v997_v51, %v1017_v53 }
  0x63   :  { %v1019_v57 = vand.u32 4294901760, %v1018_v55 }
  0x65   :  { %v1159_v59 = vpop.permute.xlu2 %1158  ;;  %v1020_v60 = vsub.f32 %v1018_v55, %v1019_v57 }
  0x66   :  { %v1160_v0 = vsel %vm18_vm0, %v1159_v59, 0 }
  0x67   :  { %v1021_v1 = vand.u32 4294901760, %v1020_v60  ;;  %v1180_v2 = vand.u32 4294901760, %v1160_v0 }
  0x69   :  { %v1181_v4 = vsub.f32 %v1160_v0, %v1180_v2 }
  0x6b   :  { %v1182_v5 = vand.u32 4294901760, %v1181_v4 }
  0x6d   :  { %v1183_v7 = vsub.f32 %v1181_v4, %v1182_v5 }
  0x74   :  { %v182_v20 = vpop.permute.xlu0 %181  ;;  %v508_v31 = vpop.permute.xlu1 %507 }
  0x75   :  { %v183_v21 = vsel %vm18_vm0, %v182_v20, 0  ;;  %v509_v33 = vsel %vm18_vm0, %v508_v31, 0 }
  0x76   :  { %v203_v22 = vand.u32 4294901760, %v183_v21  ;;  %v529_v36 = vand.u32 4294901760, %v509_v33 }
  0x78   :  { %v204_v23 = vsub.f32 %v183_v21, %v203_v22  ;;  %239 = vmatmul.f32.vlgmr.msrb.gmra.mxu3 %v203_v22  ;;  %v530_v38 = vsub.f32 %v509_v33, %v529_v36 }
  0x79   :  { %447 = vmatpush.msrb.mxu3 %v1414_v3 }
  0x7a   :  { %v205_v24 = vand.u32 4294901760, %v204_v23  ;;  %265 = vmatmul.f32.vlgmr.msra.gmra.mxu0 %v204_v23  ;;  %v531_v40 = vand.u32 4294901760, %v530_v38 }
  0x7b   :  { %449 = vmatpush.msrb.mxu3 %v1421_v6  ;;  %474 = vmatpush.msra.mxu0 %v1433_v11 }
  0x7c   :  { %v345_v25 = vpop.permute.xlu0 %344  ;;  %290 = vmatmul.f32.vlgmr.msra.gmra.mxu1 %v205_v24  ;;  %v206_v26 = vsub.f32 %v204_v23, %v205_v24  ;;  %v532_v42 = vsub.f32 %v530_v38, %v531_v40  ;;  %v833_v45 = vpop.permute.xlu1 %832 }
  0x7d   :  { %v346_v27 = vsel %vm18_vm0, %v345_v25, 0  ;;  %499 = vmatpush.msra.mxu1 %v1414_v3  ;;  %478 = vmatpush.msra.mxu0 %v1437_v13  ;;  %v834_v47 = vsel %vm18_vm0, %v833_v45, 0 }
  0x7e   :  { %v366_v28 = vand.u32 4294901760, %v346_v27  ;;  %v207_v29 = vand.u32 4294901760, %v206_v26  ;;  %v533_v44 = vand.u32 4294901760, %v532_v42  ;;  %v854_v49 = vand.u32 4294901760, %v834_v47 }
  0x7f   :  { %501 = vmatpush.msra.mxu1 %v1421_v6 }
  0x80   :  { %v367_v30 = vsub.f32 %v346_v27, %v366_v28  ;;  %208 = vmatmul.f32.vlgmr.msrb.gmra.mxu2 %v207_v29  ;;  %340 = vmatmul.f32.vlgmr.msra.gmra.mxu3 %v203_v22  ;;  %v855_v52 = vsub.f32 %v834_v47, %v854_v49 }
  0x81   :  { %422 = vmatpush.msrb.mxu2 %v1425_v8  ;;  %557 = vmatpush.msra.mxu3 %v1448_v17 }
  0x82   :  { %v368_v32 = vand.u32 4294901760, %v367_v30  ;;  %v856_v54 = vand.u32 4294901760, %v855_v52 }
  0x83   :  { %425 = vmatpush.msrb.mxu2 %v1429_v10  ;;  %563 = vmatpush.msra.mxu3 %v1452_v19 }
  0x84   :  { %v369_v34 = vsub.f32 %v367_v30, %v368_v32  ;;  %402 = vmatmul.f32.vlgmr.msrb.gmra.mxu1 %v366_v28  ;;  %v857_v56 = vsub.f32 %v855_v52, %v856_v54 }
  0x85   :  { %610 = vmatpush.msrb.mxu1 %v1414_v3 }
  0x86   :  { %v370_v35 = vand.u32 4294901760, %v369_v34  ;;  %v858_v58 = vand.u32 4294901760, %v857_v56 }
  0x87   :  { %612 = vmatpush.msrb.mxu1 %v1421_v6 }
  0x88   :  { %317 = vmatmul.f32.vlgmr.msra.gmra.mxu2 %v203_v22  ;;  %371 = vmatmul.f32.vlgmr.msrb.gmra.mxu0 %v370_v35 }
  0x89   :  { %453 = vmatmul.f32.vlgmr.msrb.gmra.mxu3 %v368_v32  ;;  %526 = vmatpush.msra.mxu2 %v1414_v3 }
  0x8a   :  { %585 = vmatpush.msrb.mxu0 %v1425_v8  ;;  %662 = vmatpush.msrb.mxu3 %v1414_v3  ;;  %v46_v61 = vpop.f32.mrf.mxu0 }
  0x8b   :  { %528 = vmatpush.msra.mxu2 %v1421_v6 }
  0x8c   :  { %503 = vmatmul.f32.vlgmr.msra.gmra.mxu1 %v366_v28  ;;  %588 = vmatpush.msrb.mxu0 %v1429_v10  ;;  %v77_v62 = vpop.f32.mrf.mxu1 }
  0x8d   :  { %664 = vmatpush.msrb.mxu3 %v1421_v6  ;;  %719 = vmatpush.msra.mxu1 %v1448_v17  ;;  %v78_v63 = vadd.f32 %v77_v62, %v46_v61 }
  0x8f   :  { %725 = vmatpush.msra.mxu1 %v1452_v19 }
  0x90   :  { %428 = vmatmul.f32.vlgmr.msrb.gmra.mxu2 %v367_v30  ;;  %480 = vmatmul.f32.vlgmr.msra.gmra.mxu0 %v366_v28 }
  0x91   :  { %565 = vmatmul.f32.vlgmr.msra.gmra.mxu3 %v529_v36  ;;  %637 = vmatpush.msrb.mxu2 %v1433_v11 }
  0x92   :  { %688 = vmatpush.msra.mxu0 %v1414_v3  ;;  %772 = vmatpush.msra.mxu3 %v1414_v3 }
  0x93   :  { %641 = vmatpush.msrb.mxu2 %v1437_v13 }
  0x94   :  { %616 = vmatmul.f32.vlgmr.msrb.gmra.mxu1 %v531_v40  ;;  %690 = vmatpush.msra.mxu0 %v1421_v6  ;;  %v178_v15 = vpop.f32.mrf.mxu1 }
  0x95   :  { %774 = vmatpush.msra.mxu3 %v1421_v6  ;;  %824 = vmatpush.msrb.mxu1 %v1414_v3 }
  0x97   :  { %826 = vmatpush.msrb.mxu1 %v1421_v6 }
  0x98   :  { %534 = vmatmul.f32.vlgmr.msra.gmra.mxu2 %v533_v44  ;;  %591 = vmatmul.f32.vlgmr.msrb.gmra.mxu0 %v530_v38 }
  0x99   :  { %666 = vmatmul.f32.vlgmr.msrb.gmra.mxu3 %v529_v36  ;;  %747 = vmatpush.msra.mxu2 %v1425_v8 }
  0x9a   :  { %799 = vmatpush.msrb.mxu0 %v1433_v11  ;;  %882 = vmatpush.msrb.mxu3 %v1448_v17 }
  0x9b   :  { %750 = vmatpush.msra.mxu2 %v1429_v10 }
  0x9c   :  { %727 = vmatmul.f32.vlgmr.msra.gmra.mxu1 %v691_v39  ;;  %803 = vmatpush.msrb.mxu0 %v1437_v13 }
  0x9d   :  { %888 = vmatpush.msrb.mxu3 %v1452_v19  ;;  %935 = vmatpush.msra.mxu1 %v1414_v3 }
  0x9f   :  { %937 = vmatpush.msra.mxu1 %v1421_v6 }
  0xa0   :  { %643 = vmatmul.f32.vlgmr.msrb.gmra.mxu2 %v529_v36  ;;  %696 = vmatmul.f32.vlgmr.msra.gmra.mxu0 %v695_v48 }
  0xa1   :  { %778 = vmatmul.f32.vlgmr.msra.gmra.mxu3 %v693_v43  ;;  %851 = vmatpush.msrb.mxu2 %v1414_v3 }
  0xa2   :  { %910 = vmatpush.msra.mxu0 %v1425_v8  ;;  %987 = vmatpush.msra.mxu3 %v1414_v3 }
  0xa3   :  { %853 = vmatpush.msrb.mxu2 %v1421_v6 }
  0xa4   :  { %828 = vmatmul.f32.vlgmr.msrb.gmra.mxu1 %v691_v39  ;;  %913 = vmatpush.msra.mxu0 %v1429_v10 }
  0xa5   :  { %989 = vmatpush.msra.mxu3 %v1421_v6  ;;  %1045 = vmatpush.msrb.mxu1 %v1448_v17 }
  0xa7   :  { %1051 = vmatpush.msrb.mxu1 %v1452_v19 }
  0xa8   :  { %753 = vmatmul.f32.vlgmr.msra.gmra.mxu2 %v692_v41  ;;  %805 = vmatmul.f32.vlgmr.msrb.gmra.mxu0 %v691_v39 }
  0xa9   :  { %890 = vmatmul.f32.vlgmr.msrb.gmra.mxu3 %v854_v49  ;;  %962 = vmatpush.msra.mxu2 %v1433_v11 }
  0xaa   :  { %1014 = vmatpush.msrb.mxu0 %v1414_v3  ;;  %1098 = vmatpush.msrb.mxu3 %v1414_v3 }
  0xab   :  { %966 = vmatpush.msra.mxu2 %v1437_v13 }
  0xac   :  { %941 = vmatmul.f32.vlgmr.msra.gmra.mxu1 %v856_v54  ;;  %1016 = vmatpush.msrb.mxu0 %v1421_v6 }
  0xad   :  { %1100 = vmatpush.msrb.mxu3 %v1421_v6  ;;  %1150 = vmatpush.msra.mxu1 %v1414_v3 }
  0xaf   :  { %1152 = vmatpush.msra.mxu1 %v1421_v6 }
  0xb0   :  { %859 = vmatmul.f32.vlgmr.msrb.gmra.mxu2 %v858_v58  ;;  %916 = vmatmul.f32.vlgmr.msra.gmra.mxu0 %v855_v52 }
  0xb1   :  { %991 = vmatmul.f32.vlgmr.msra.gmra.mxu3 %v854_v49  ;;  %1073 = vmatpush.msrb.mxu2 %v1425_v8 }
  0xb2   :  { %1125 = vmatpush.msra.mxu0 %v1433_v11  ;;  %1208 = vmatpush.msra.mxu3 %v1448_v17 }
  0xb3   :  { %1076 = vmatpush.msrb.mxu2 %v1429_v10 }
  0xb4   :  { %1053 = vmatmul.f32.vlgmr.msrb.gmra.mxu1 %v1017_v53  ;;  %1129 = vmatpush.msra.mxu0 %v1437_v13 }
  0xb5   :  { %1214 = vmatpush.msra.mxu3 %v1452_v19  ;;  %1261 = vmatpush.msrb.mxu1 %v1414_v3 }
  0xb7   :  { %1263 = vmatpush.msrb.mxu1 %v1421_v6 }
  0xb8   :  { %968 = vmatmul.f32.vlgmr.msra.gmra.mxu2 %v854_v49  ;;  %1022 = vmatmul.f32.vlgmr.msrb.gmra.mxu0 %v1021_v1 }
  0xb9   :  { %1104 = vmatmul.f32.vlgmr.msrb.gmra.mxu3 %v1019_v57  ;;  %1177 = vmatpush.msra.mxu2 %v1414_v3 }
  0xba   :  { %1236 = vmatpush.msrb.mxu0 %v1425_v8  ;;  %1313 = vmatpush.msrb.mxu3 %v1414_v3  ;;  %v1184_v8 = vand.u32 4294901760, %v1183_v7  ;;  %v103_v3 = vpop.f32.mrf.mxu2 }
  0xbb   :  { %1179 = vmatpush.msra.mxu2 %v1421_v6  ;;  %v104_v9 = vadd.f32 %v103_v3, %v78_v63 }
  0xbc   :  { %1154 = vmatmul.f32.vlgmr.msra.gmra.mxu1 %v1017_v53  ;;  %1239 = vmatpush.msrb.mxu0 %v1429_v10  ;;  %v128_v10 = vpop.f32.mrf.mxu3 }
  0xbd   :  { %1315 = vmatpush.msrb.mxu3 %v1421_v6  ;;  %v129_v12 = vadd.f32 %v128_v10, %v104_v9  ;;  %v155_v6 = vpop.f32.mrf.mxu0 }
  0xbf   :  { %v156_v14 = vadd.f32 %v155_v6, %v129_v12 }
  0xc0   :  { %1079 = vmatmul.f32.vlgmr.msrb.gmra.mxu2 %v1018_v55  ;;  %1131 = vmatmul.f32.vlgmr.msra.gmra.mxu0 %v1017_v53 }
  0xc1   :  { %1216 = vmatmul.f32.vlgmr.msra.gmra.mxu3 %v1180_v2  ;;  %1288 = vmatpush.msrb.mxu2 %v1433_v11  ;;  %v1551_v16 = vadd.f32 %v178_v15, %v156_v14 }
  0xc3   :  { %1292 = vmatpush.msrb.mxu2 %v1437_v13 }
  0xc4   :  { %1267 = vmatmul.f32.vlgmr.msrb.gmra.mxu1 %v1182_v5 }
  0xc8   :  { %1185 = vmatmul.f32.vlgmr.msra.gmra.mxu2 %v1184_v8  ;;  %1242 = vmatmul.f32.vlgmr.msrb.gmra.mxu0 %v1181_v4 }
  0xc9   :  { %1317 = vmatmul.f32.vlgmr.msrb.gmra.mxu3 %v1180_v2 }
  0xd0   :  { %1294 = vmatmul.f32.vlgmr.msrb.gmra.mxu2 %v1180_v2 }
  0xf7   :  { %v266_v18 = vpop.f32.mrf.mxu0 }
  0xf9   :  { %v291_v17 = vpop.f32.mrf.mxu1 }
  0xfb   :  { %v240_v11 = vpop.f32.mrf.mxu3 }
 0x101   :  { %v403_v19 = vpop.f32.mrf.mxu1 }
 0x103   :  { %v209_v13 = vpop.f32.mrf.mxu2  ;;  %v341_v20 = vpop.f32.mrf.mxu3 }
 0x104   :  { %v241_v21 = vadd.f32 %v240_v11, %v209_v13 }
 0x105   :  { %v372_v22 = vpop.f32.mrf.mxu0 }
 0x106   :  { %v267_v23 = vadd.f32 %v266_v18, %v241_v21  ;;  %v404_v31 = vadd.f32 %v403_v19, %v372_v22 }
 0x108   :  { %v292_v24 = vadd.f32 %v291_v17, %v267_v23 }
 0x109   :  { %v504_v25 = vpop.f32.mrf.mxu1 }
 0x10b   :  { %v318_v26 = vpop.f32.mrf.mxu2 }
 0x10c   :  { %v319_v27 = vadd.f32 %v318_v26, %v292_v24  ;;  %v454_v28 = vpop.f32.mrf.mxu3 }
 0x10d   :  { %v481_v29 = vpop.f32.mrf.mxu0 }
 0x10e   :  { %v342_v30 = vadd.f32 %v341_v20, %v319_v27 }
 0x110   :  { %1322 = vrot.lane.b32.xlu0 %v342_v30, %s1380_s0 }
 0x111   :  { %v617_v35 = vpop.f32.mrf.mxu1 }
 0x113   :  { %v429_v32 = vpop.f32.mrf.mxu2 }
 0x114   :  { %v430_v33 = vadd.f32 %v429_v32, %v404_v31  ;;  %v566_v34 = vpop.f32.mrf.mxu3 }
 0x115   :  { %v592_v36 = vpop.f32.mrf.mxu0 }
 0x116   :  { %v455_v37 = vadd.f32 %v454_v28, %v430_v33 }
 0x118   :  { %v482_v38 = vadd.f32 %v481_v29, %v455_v37 }
 0x119   :  { %v728_v45 = vpop.f32.mrf.mxu1 }
 0x11a   :  { %v505_v39 = vadd.f32 %v504_v25, %v482_v38 }
 0x11b   :  { %v535_v40 = vpop.f32.mrf.mxu2 }
 0x11c   :  { %v567_v41 = vadd.f32 %v566_v34, %v535_v40  ;;  %v667_v42 = vpop.f32.mrf.mxu3  ;;  %1326 = vrot.lane.b32.xlu1 %v505_v39, %s1381_s1 }
 0x11d   :  { %v697_v43 = vpop.f32.mrf.mxu0 }
 0x11e   :  { %v593_v44 = vadd.f32 %v592_v36, %v567_v41  ;;  %v729_v53 = vadd.f32 %v728_v45, %v697_v43 }
 0x120   :  { %v618_v46 = vadd.f32 %v617_v35, %v593_v44 }
 0x121   :  { %v829_v52 = vpop.f32.mrf.mxu1 }
 0x123   :  { %v644_v47 = vpop.f32.mrf.mxu2 }
 0x124   :  { %v645_v48 = vadd.f32 %v644_v47, %v618_v46  ;;  %v779_v49 = vpop.f32.mrf.mxu3 }
 0x125   :  { %v806_v50 = vpop.f32.mrf.mxu0 }
 0x126   :  { %v668_v51 = vadd.f32 %v667_v42, %v645_v48 }
 0x128   :  { %1330 = vrot.lane.b32.xlu2 %v668_v51, %s1382_s20 }
 0x129   :  { %v942_v61 = vpop.f32.mrf.mxu1 }
 0x12b   :  { %v754_v54 = vpop.f32.mrf.mxu2 }
 0x12c   :  { %v755_v55 = vadd.f32 %v754_v54, %v729_v53  ;;  %v891_v56 = vpop.f32.mrf.mxu3 }
 0x12d   :  { %v917_v58 = vpop.f32.mrf.mxu0 }
 0x12e   :  { %v780_v57 = vadd.f32 %v779_v49, %v755_v55 }
 0x130   :  { %v807_v59 = vadd.f32 %v806_v50, %v780_v57 }
 0x131   :  { %v1054_v8 = vpop.f32.mrf.mxu1 }
 0x132   :  { %v830_v60 = vadd.f32 %v829_v52, %v807_v59 }
 0x133   :  { %v860_v62 = vpop.f32.mrf.mxu2 }
 0x134   :  { %v892_v63 = vadd.f32 %v891_v56, %v860_v62  ;;  %1334 = vrot.lane.b32.xlu0 %v830_v60, %s1378_s14  ;;  %v992_v1 = vpop.f32.mrf.mxu3 }
 0x135   :  { %v1023_v2 = vpop.f32.mrf.mxu0 }
 0x136   :  { %v918_v0 = vadd.f32 %v917_v58, %v892_v63  ;;  %v1055_v10 = vadd.f32 %v1054_v8, %v1023_v2 }
 0x138   :  { %v943_v4 = vadd.f32 %v942_v61, %v918_v0 }
 0x139   :  { %v1155_v17 = vpop.f32.mrf.mxu1 }
 0x13b   :  { %v969_v5 = vpop.f32.mrf.mxu2 }
 0x13c   :  { %v970_v7 = vadd.f32 %v969_v5, %v943_v4  ;;  %v1105_v9 = vpop.f32.mrf.mxu3 }
 0x13d   :  { %v1132_v12 = vpop.f32.mrf.mxu0 }
 0x13e   :  { %v993_v3 = vadd.f32 %v992_v1, %v970_v7 }
 0x140   :  { %1338 = vrot.lane.b32.xlu1 %v993_v3, %s1383_s21 }
 0x141   :  { %v1268_v23 = vpop.f32.mrf.mxu1 }
 0x143   :  { %v1080_v6 = vpop.f32.mrf.mxu2 }
 0x144   :  { %v1081_v14 = vadd.f32 %v1080_v6, %v1055_v10  ;;  %v1217_v19 = vpop.f32.mrf.mxu3 }
 0x145   :  { %v1243_v21 = vpop.f32.mrf.mxu0 }
 0x146   :  { %v1106_v15 = vadd.f32 %v1105_v9, %v1081_v14 }
 0x148   :  { %v1133_v11 = vadd.f32 %v1132_v12, %v1106_v15 }
 0x14a   :  { %v1156_v18 = vadd.f32 %v1155_v17, %v1133_v11 }
 0x14b   :  { %v1186_v13 = vpop.f32.mrf.mxu2 }
 0x14c   :  { %v1218_v20 = vadd.f32 %v1217_v19, %v1186_v13  ;;  %1342 = vrot.lane.b32.xlu2 %v1156_v18, %s1384_s22  ;;  %v1318_v27 = vpop.f32.mrf.mxu3 }
 0x14e   :  { %v1244_v22 = vadd.f32 %v1243_v21, %v1218_v20 }
 0x150   :  { %v1269_v24 = vadd.f32 %v1268_v23, %v1244_v22 }
 0x153   :  { %v1295_v25 = vpop.f32.mrf.mxu2 }
 0x154   :  { %v1296_v26 = vadd.f32 %v1295_v25, %v1269_v24 }
 0x156   :  { %v1319_v28 = vadd.f32 %v1318_v27, %v1296_v26 }
 0x158   :  { %1346 = vrot.lane.b32.xlu0 %v1319_v28, %s1385_s23 }
 0x182   :  { %v1323_v29 = vpop.permute.xlu0 %1322  ;;  %v1331_v31 = vpop.permute.xlu2 %1330 }
 0x183   :  { %v1350_v32 = vsel %vm1349_vm1, %v1551_v16, %v1323_v29 }
 0x18e   :  { %v1327_v30 = vpop.permute.xlu1 %1326 }
 0x18f   :  { %v1351_v33 = vsel %vm18_vm0, %v1350_v32, %v1327_v30 }
 0x190   :  { %v1353_v36 = vsel %vm1352_vm2, %v1351_v33, %v1331_v31 }
 0x1a6   :  { %v1335_v34 = vpop.permute.xlu0 %1334  ;;  %v1343_v39 = vpop.permute.xlu2 %1342 }
 0x1a7   :  { %v1355_v37 = vsel %vm1354_vm3, %v1353_v36, %v1335_v34 }
 0x1b2   :  { %v1339_v35 = vpop.permute.xlu1 %1338 }
 0x1b3   :  { %v1357_v38 = vsel %vm1356_vm4, %v1355_v37, %v1339_v35 }
 0x1b4   :  { %v1359_v41 = vsel %vm1358_vm5, %v1357_v38, %v1343_v39 }
 0x1ca   :  { %v1347_v40 = vpop.permute.xlu0 %1346 }
 0x1cb   :  { %v1361_v42 = vsel %vm1360_vm6, %v1359_v41, %v1347_v40 }
 0x1cc   :  { %1363 = vst.msk [vmem:[%s1561_s2] sm:$0xff] %vm1362_vm7, %v1361_v42 }

</bundles_post_ra>
